<compile_context>
chip_gen: v5e
topology: v5e:2x2
jax: 0.10.0
libtpu: 0.0.40
codegen_flags: <defaults>
</compile_context>

<pallas_src>
import functools

import jax
import jax.numpy as jnp
from jax.experimental import pallas as pl
from jax.experimental.pallas import tpu as pltpu

_LANE = 128  # padded fused-feature width (one full lane set)


def _ac_kernel(x_ref, w1_ref, w2_ref, w3_ref, b_ref, out_ref, *, num_actions):
    """Fused actor+critic MLP (3 shared bf16 matmuls) + masked softmax, lane-dense output."""
    # bf16 operands for the MXU native path; accumulation and elementwise math stay f32.
    x = x_ref[...].astype(jnp.bfloat16)  # mirrors x.float() in torch, then MXU-native cast

    h = jnp.dot(x, w1_ref[...], preferred_element_type=jnp.float32) + b_ref[0:1, :]
    h = jnp.maximum(h, 0.0)
    h = jnp.dot(h.astype(jnp.bfloat16), w2_ref[...],
                preferred_element_type=jnp.float32) + b_ref[1:2, :]
    h = jnp.maximum(h, 0.0)
    z = jnp.dot(h.astype(jnp.bfloat16), w3_ref[...],
                preferred_element_type=jnp.float32) + b_ref[2:3, :]
    # z: (TB, 128) with lane 0 = critic value, lanes 1..num_actions = actor logits.

    col = jax.lax.broadcasted_iota(jnp.int32, z.shape, 1)
    is_logit = (col >= 1) & (col <= num_actions)
    mu = jnp.where(is_logit, z, -jnp.inf)       # value lane + padding can't leak prob mass
    m = jnp.max(mu, axis=1, keepdims=True)
    e = jnp.exp(mu - m)
    probs = e * pl.reciprocal(jnp.sum(e, axis=1, keepdims=True), approx=False)

    # Single lane-dense store: value in lane 0, probs in lanes 1..A, zeros elsewhere.
    out_ref[...] = jnp.where(col == 0, z, probs)


def pack_ac_params(critic_params, actor_params):
    """Fuse both heads into 3 block-diagonal, 128-lane-padded bf16 weights + stacked f32 bias.

    critic_params / actor_params: list of 3 (W, b); W shaped (in, out), b shaped (1, out).
    """
    (wc1, bc1), (wc2, bc2), (wc3, bc3) = critic_params
    (wa1, ba1), (wa2, ba2), (wa3, ba3) = actor_params
    in_dim = wc1.shape[0]
    hc1, hc2 = wc1.shape[1], wc2.shape[1]
    ha1, ha2 = wa1.shape[1], wa2.shape[1]
    num_actions = wa3.shape[1]
    assert hc1 + ha1 <= _LANE and hc2 + ha2 <= _LANE and 1 + num_actions <= _LANE

    # Layer 1: [critic | actor | 0-pad] along the output lanes.
    w1 = jnp.zeros((in_dim, _LANE), jnp.float32)
    w1 = w1.at[:, :hc1].set(wc1).at[:, hc1:hc1 + ha1].set(wa1)
    b1 = jnp.zeros((_LANE,), jnp.float32)
    b1 = b1.at[:hc1].set(bc1[0]).at[hc1:hc1 + ha1].set(ba1[0])

    # Layer 2: block-diagonal so the two heads stay independent.
    w2 = jnp.zeros((_LANE, _LANE), jnp.float32)
    w2 = w2.at[:hc1, :hc2].set(wc2).at[hc1:hc1 + ha1, hc2:hc2 + ha2].set(wa2)
    b2 = jnp.zeros((_LANE,), jnp.float32)
    b2 = b2.at[:hc2].set(bc2[0]).at[hc2:hc2 + ha2].set(ba2[0])

    # Layer 3: critic -> lane 0 (value), actor -> lanes 1..num_actions (logits).
    w3 = jnp.zeros((_LANE, _LANE), jnp.float32)
    w3 = w3.at[:hc2, 0:1].set(wc3).at[hc2:hc2 + ha2, 1:1 + num_actions].set(wa3)
    b3 = jnp.zeros((_LANE,), jnp.float32)
    b3 = b3.at[0:1].set(bc3[0]).at[1:1 + num_actions].set(ba3[0])

    b_all = jnp.stack([b1, b2, b3], axis=0)  # (3, 128) f32 (biases stay f32)
    return (w1.astype(jnp.bfloat16), w2.astype(jnp.bfloat16), w3.astype(jnp.bfloat16),
            b_all, num_actions, in_dim)


def ac_cnn_forward(x, packed, *, block_b=256):
    """Runs the fused Pallas kernel. Returns (probs, value)."""
    w1, w2, w3, b_all, num_actions, in_dim = packed
    B = x.shape[0]
    assert x.shape[1] == in_dim
    block_b = min(block_b, B)
    grid = (pl.cdiv(B, block_b),)

    def resident(shape):
        # Full-array block, same block every grid step -> stays VMEM-resident.
        return pl.BlockSpec(shape, lambda i: (0, 0))

    out = pl.pallas_call(
        functools.partial(_ac_kernel, num_actions=num_actions),
        out_shape=jax.ShapeDtypeStruct((B, _LANE), jnp.float32),
        grid=grid,
        in_specs=[
            pl.BlockSpec((block_b, in_dim), lambda i: (i, 0)),   # x, tiled over batch
            resident(w1.shape), resident(w2.shape), resident(w3.shape),
            resident(b_all.shape),
        ],
        out_specs=pl.BlockSpec((block_b, _LANE), lambda i: (i, 0)),
        compiler_params=pltpu.CompilerParams(
            dimension_semantics=("parallel",)),  # v7x: shard batch across both TCs
    )(x.astype(jnp.float32), w1, w2, w3, b_all)

    value = out[:, 0:1]
    probs = out[:, 1:1 + num_actions]
    return probs, value


def init_linear(key, in_f, out_f):
    """nn.init.normal_(weight, 0.0, 0.1) with torch (out,in) -> transposed to (in,out);
    nn.init.constant_(bias, 0.1)."""
    w = 0.1 * jax.random.normal(key, (in_f, out_f), dtype=jnp.float32)
    b = jnp.full((1, out_f), 0.1, dtype=jnp.float32)
    return w, b


def build_params(key, input_shape, num_actions, hidden_actor, hidden_critic):
    in_dim = input_shape + num_actions
    critic_dims = list(zip([in_dim] + hidden_critic, hidden_critic + [1]))
    actor_dims = list(zip([in_dim] + hidden_actor, hidden_actor + [num_actions]))
    keys = jax.random.split(key, len(critic_dims) + len(actor_dims))
    critic_params = [init_linear(k, i, o)
                     for k, (i, o) in zip(keys[:len(critic_dims)], critic_dims)]
    actor_params = [init_linear(k, i, o)
                    for k, (i, o) in zip(keys[len(critic_dims):], actor_dims)]
    return critic_params, actor_params


def reference_forward(x, critic_params, actor_params):
    """Pure-JAX f32 reference of the torch forward (discrete branch)."""
    def mlp(h, params):
        for i, (w, b) in enumerate(params):
            h = h @ w + b
            if i != len(params) - 1:
                h = jnp.maximum(h, 0.0)
        return h
    value = mlp(x.astype(jnp.float32), critic_params)
    mu = mlp(x.astype(jnp.float32), actor_params)
    probs = jax.nn.softmax(mu, axis=1)
    return probs, value


if __name__ == "__main__":
    # Small shapes consistent with the module: state vector + action vector features.
    input_shape = 28
    num_actions = 4
    hidden_actor = [32, 32]
    hidden_critic = [32, 32]
    batch = 8

    key = jax.random.PRNGKey(0)
    key_x, key_p = jax.random.split(key)

    x = jax.random.normal(key_x, (batch, input_shape + num_actions), dtype=jnp.float32)
    critic_params, actor_params = build_params(
        key_p, input_shape, num_actions, hidden_actor, hidden_critic)

    packed = pack_ac_params(critic_params, actor_params)
    probs, value = ac_cnn_forward(x, packed)
    jax.block_until_ready((probs, value))

    # Correctness check against pure-JAX f32 reference (tolerance loosened for bf16 MXU ops).
    probs_ref, value_ref = reference_forward(x, critic_params, actor_params)
    assert probs.shape == (batch, num_actions)
    assert value.shape == (batch, 1)
    assert jnp.allclose(probs, probs_ref, atol=2e-2, rtol=2e-2), \
        float(jnp.max(jnp.abs(probs - probs_ref)))
    assert jnp.allclose(value, value_ref, atol=2e-2, rtol=2e-2), \
        float(jnp.max(jnp.abs(value - value_ref)))
    assert jnp.allclose(jnp.sum(probs, axis=1), 1.0, atol=1e-5)

    print("KERNEL_OK")
</pallas_src>

<mosaic_0001>
module attributes {stable_mosaic.version = 11 : i64} {
  func.func @_ac_kernel(%arg0: i32, %arg1: memref<8x32xf32, #tpu.memory_space<vmem>>, %arg2: memref<32x128xbf16, #tpu.memory_space<vmem>>, %arg3: memref<128x128xbf16, #tpu.memory_space<vmem>>, %arg4: memref<128x128xbf16, #tpu.memory_space<vmem>>, %arg5: memref<3x128xf32, #tpu.memory_space<vmem>>, %arg6: memref<8x128xf32, #tpu.memory_space<vmem>>) attributes {dimension_semantics = [#tpu.dimension_semantics<parallel>], iteration_bounds = array<i64: 1>, scalar_prefetch = 0 : i64, scratch_operands = 0 : i64, tpu.core_type = #tpu.core_type<tc>, window_params = [{transform_indices = @transform_0, window_bounds = array<i64: 8, 32>}, {pipeline_mode = #tpu.pipeline_mode<synchronous>, transform_indices = @transform_1, window_bounds = array<i64: 32, 128>}, {pipeline_mode = #tpu.pipeline_mode<synchronous>, transform_indices = @transform_2, window_bounds = array<i64: 128, 128>}, {pipeline_mode = #tpu.pipeline_mode<synchronous>, transform_indices = @transform_3, window_bounds = array<i64: 128, 128>}, {pipeline_mode = #tpu.pipeline_mode<synchronous>, transform_indices = @transform_4, window_bounds = array<i64: 3, 128>}, {transform_indices = @transform_5, window_bounds = array<i64: 8, 128>}]} {
    %c0 = arith.constant 0 : index
    %c0_0 = arith.constant 0 : index
    %0 = vector.load %arg1[%c0, %c0_0] : memref<8x32xf32, #tpu.memory_space<vmem>>, vector<8x32xf32>
    %1 = arith.truncf %0 : vector<8x32xf32> to vector<8x32xbf16>
    %c0_1 = arith.constant 0 : index
    %c0_2 = arith.constant 0 : index
    %2 = vector.load %arg2[%c0_1, %c0_2] : memref<32x128xbf16, #tpu.memory_space<vmem>>, vector<32x128xbf16>
    %cst = arith.constant dense<0.000000e+00> : vector<8x128xf32>
    %3 = tpu.matmul %1, %2, %cst {dimension_numbers = #tpu.dot_dimension_numbers<[1], [0], [0], [1], [0, 0, 1, 1], [], []>} : vector<8x32xbf16>, vector<32x128xbf16>, vector<8x128xf32> -> vector<8x128xf32>
    %c0_3 = arith.constant 0 : index
    %c0_4 = arith.constant 0 : index
    %4 = vector.load %arg5[%c0_3, %c0_4] : memref<3x128xf32, #tpu.memory_space<vmem>>, vector<1x128xf32>
    %5 = vector.broadcast %4 : vector<1x128xf32> to vector<8x128xf32>
    %6 = arith.addf %3, %5 : vector<8x128xf32>
    %cst_5 = arith.constant 0.000000e+00 : f32
    %7 = vector.broadcast %cst_5 : f32 to vector<8x128xf32>
    %8 = arith.maximumf %6, %7 : vector<8x128xf32>
    %9 = arith.truncf %8 : vector<8x128xf32> to vector<8x128xbf16>
    %c0_6 = arith.constant 0 : index
    %c0_7 = arith.constant 0 : index
    %10 = vector.load %arg3[%c0_6, %c0_7] : memref<128x128xbf16, #tpu.memory_space<vmem>>, vector<128x128xbf16>
    %cst_8 = arith.constant dense<0.000000e+00> : vector<8x128xf32>
    %11 = tpu.matmul %9, %10, %cst_8 {dimension_numbers = #tpu.dot_dimension_numbers<[1], [0], [0], [1], [0, 0, 1, 1], [], []>} : vector<8x128xbf16>, vector<128x128xbf16>, vector<8x128xf32> -> vector<8x128xf32>
    %c1 = arith.constant 1 : index
    %c0_9 = arith.constant 0 : index
    %12 = vector.load %arg5[%c1, %c0_9] : memref<3x128xf32, #tpu.memory_space<vmem>>, vector<1x128xf32>
    %13 = vector.broadcast %12 : vector<1x128xf32> to vector<8x128xf32>
    %14 = arith.addf %11, %13 : vector<8x128xf32>
    %cst_10 = arith.constant 0.000000e+00 : f32
    %15 = vector.broadcast %cst_10 : f32 to vector<8x128xf32>
    %16 = arith.maximumf %14, %15 : vector<8x128xf32>
    %17 = arith.truncf %16 : vector<8x128xf32> to vector<8x128xbf16>
    %c0_11 = arith.constant 0 : index
    %c0_12 = arith.constant 0 : index
    %18 = vector.load %arg4[%c0_11, %c0_12] : memref<128x128xbf16, #tpu.memory_space<vmem>>, vector<128x128xbf16>
    %cst_13 = arith.constant dense<0.000000e+00> : vector<8x128xf32>
    %19 = tpu.matmul %17, %18, %cst_13 {dimension_numbers = #tpu.dot_dimension_numbers<[1], [0], [0], [1], [0, 0, 1, 1], [], []>} : vector<8x128xbf16>, vector<128x128xbf16>, vector<8x128xf32> -> vector<8x128xf32>
    %c2 = arith.constant 2 : index
    %c0_14 = arith.constant 0 : index
    %20 = vector.load %arg5[%c2, %c0_14] : memref<3x128xf32, #tpu.memory_space<vmem>>, vector<1x128xf32>
    %21 = vector.broadcast %20 : vector<1x128xf32> to vector<8x128xf32>
    %22 = arith.addf %19, %21 : vector<8x128xf32>
    %23 = tpu.iota {dimensions = array<i32: 1>} : vector<8x128xi32>
    %c1_i32 = arith.constant 1 : i32
    %24 = vector.broadcast %c1_i32 : i32 to vector<8x128xi32>
    %25 = arith.cmpi sge, %23, %24 : vector<8x128xi32>
    %c4_i32 = arith.constant 4 : i32
    %26 = vector.broadcast %c4_i32 : i32 to vector<8x128xi32>
    %27 = arith.cmpi sle, %23, %26 : vector<8x128xi32>
    %28 = arith.andi %25, %27 : vector<8x128xi1>
    %cst_15 = arith.constant 0xFF800000 : f32
    %29 = vector.broadcast %cst_15 : f32 to vector<8x128xf32>
    %30 = arith.select %28, %22, %29 : vector<8x128xi1>, vector<8x128xf32>
    %cst_16 = arith.constant dense<0xFF800000> : vector<8xf32>
    %31 = vector.multi_reduction <maximumf>, %30, %cst_16 [1] : vector<8x128xf32> to vector<8xf32>
    %32 = vector.shape_cast %31 : vector<8xf32> to vector<8x1xf32>
    %33 = vector.broadcast %32 : vector<8x1xf32> to vector<8x128xf32>
    %34 = arith.subf %30, %33 : vector<8x128xf32>
    %35 = math.exp %34 : vector<8x128xf32>
    %cst_17 = arith.constant dense<0.000000e+00> : vector<8xf32>
    %36 = vector.multi_reduction <add>, %35, %cst_17 [1] : vector<8x128xf32> to vector<8xf32>
    %37 = vector.shape_cast %36 : vector<8xf32> to vector<8x1xf32>
    %38 = tpu.reciprocal %37 : vector<8x1xf32> -> vector<8x1xf32>
    %39 = vector.broadcast %38 : vector<8x1xf32> to vector<8x128xf32>
    %40 = arith.mulf %35, %39 : vector<8x128xf32>
    %c0_i32 = arith.constant 0 : i32
    %41 = vector.broadcast %c0_i32 : i32 to vector<8x128xi32>
    %42 = arith.cmpi eq, %23, %41 : vector<8x128xi32>
    %43 = arith.select %42, %22, %40 : vector<8x128xi1>, vector<8x128xf32>
    %c0_18 = arith.constant 0 : index
    %c0_19 = arith.constant 0 : index
    %44 = vector.load %arg6[%c0_18, %c0_19] : memref<8x128xf32, #tpu.memory_space<vmem>>, vector<8x128xf32>
    tpu.vector_store %arg6[%c0_18, %c0_19], %43 {strides = array<i32>} : memref<8x128xf32, #tpu.memory_space<vmem>>, vector<8x128xf32>,
    return
  }
  func.func @transform_0(%arg0: i32) -> (i32, i32) {
    %c0_i32 = arith.constant 0 : i32
    %c0_i32_0 = arith.constant 0 : i32
    return %arg0, %c0_i32 : i32, i32
  }
  func.func @transform_1(%arg0: i32) -> (i32, i32) {
    %c0_i32 = arith.constant 0 : i32
    %c0_i32_0 = arith.constant 0 : i32
    %c0_i32_1 = arith.constant 0 : i32
    return %c0_i32, %c0_i32_0 : i32, i32
  }
  func.func @transform_2(%arg0: i32) -> (i32, i32) {
    %c0_i32 = arith.constant 0 : i32
    %c0_i32_0 = arith.constant 0 : i32
    %c0_i32_1 = arith.constant 0 : i32
    return %c0_i32, %c0_i32_0 : i32, i32
  }
  func.func @transform_3(%arg0: i32) -> (i32, i32) {
    %c0_i32 = arith.constant 0 : i32
    %c0_i32_0 = arith.constant 0 : i32
    %c0_i32_1 = arith.constant 0 : i32
    return %c0_i32, %c0_i32_0 : i32, i32
  }
  func.func @transform_4(%arg0: i32) -> (i32, i32) {
    %c0_i32 = arith.constant 0 : i32
    %c0_i32_0 = arith.constant 0 : i32
    %c0_i32_1 = arith.constant 0 : i32
    return %c0_i32, %c0_i32_0 : i32, i32
  }
  func.func @transform_5(%arg0: i32) -> (i32, i32) {
    %c0_i32 = arith.constant 0 : i32
    %c0_i32_0 = arith.constant 0 : i32
    return %arg0, %c0_i32 : i32, i32
  }
}

</mosaic_0001>

<bundles_post_ra>
// kernel: tpu_custom_call.1
= control target key start
LH: loop header
LB: loop body
LE: loop exit
PB: predicated region body
PF: predicated region fallthrough
CT: control target
= control target key end

     0   :  { %10 = vsyncpa [#allocation3], 0  ;;  %s659_s0 = inlined_call_operand.hbm [shape: f32[8,32], index: 0, kind: input, shape index: {}]   ;;  %s660_s1 = inlined_call_operand.hbm [shape: bf16[32,128], index: 1, kind: input, shape index: {}]   ;;  %s661_s2 = inlined_call_operand.hbm [shape: bf16[128,128], index: 2, kind: input, shape index: {}]   ;;  %s662_s3 = inlined_call_operand.hbm [shape: bf16[128,128], index: 3, kind: input, shape index: {}]   ;;  %s663_s4 = inlined_call_operand.hbm [shape: f32[3,128], index: 4, kind: input, shape index: {}]   ;;  %s664_s5 = inlined_call_operand.hbm [shape: f32[8,128], index: 5, kind: output, shape index: {}]  }
   0x1   :  { %11 = vsyncpa [#allocation6], 0 }
   0x2   :  { %12 = vsyncpa [#allocation9], 0  ;;  %s29_s20 = sshll.u32 %s660_s1, 4  ;;  %s30_s20 = int_to_ptr.hbm [resolvable:$true] %s29_s20 }
   0x3   :  { %13 = vsyncpa [#allocation4], 0  ;;  %s603_s21 = smov [#allocation5]   ;;  %s55_s25 = sshll.u32 %s662_s3, 4  ;;  %s56_s25 = int_to_ptr.hbm [resolvable:$true] %s55_s25 }
   0x4   :  { %s31_s22 = sshll.u32 %s603_s21, 4  ;;  %s604_s26 = smov 64   ;;  %s32_s22 = int_to_ptr.vmem [resolvable:$true] %s31_s22 }
   0x5   :  { %s605_s27 = smov 4   ;;  %s606_s28 = smov [#allocation8]  }
   0x6   :  { %37 = dma.hbm_to_vmem [thread:$0]  %s30_s20, 256, %s32_s22, [#allocation6], %s604_s26, %s604_s26, %s605_s27  }
   0x7   :  { %s57_s29 = sshll.u32 %s606_s28, 4  ;;  %s19_s7 = sshll.u32 %s659_s0, 4  ;;  %s58_s29 = int_to_ptr.vmem [resolvable:$true] %s57_s29  ;;  %s20_s7 = int_to_ptr.hbm [resolvable:$true] %s19_s7 }
   0x8   :  { %63 = dma.hbm_to_vmem [thread:$0]  %s56_s25, 1024, %s58_s29, [#allocation9], %s604_s26, %s604_s26, %s605_s27  }
   0x9   :  { %s42_s9 = sshll.u32 %s661_s2, 4  ;;  %s607_s10 = smov [#allocation2]   ;;  %s43_s9 = int_to_ptr.hbm [resolvable:$true] %s42_s9 }
   0xa   :  { %s21_s11 = sshll.u32 %s607_s10, 4  ;;  %s608_s3 = smov [#allocation7]   ;;  %s22_s11 = int_to_ptr.vmem [resolvable:$true] %s21_s11 }
   0xb   :  { %24 = dma.hbm_to_vmem [thread:$0]  %s20_s7, 128, %s22_s11, [#allocation3]  }
   0xc   :  { %s44_s12 = sshll.u32 %s608_s3, 4  ;;  %s69_s15 = sshll.u32 %s663_s4, 4  ;;  %s45_s12 = int_to_ptr.vmem [resolvable:$true] %s44_s12  ;;  %s70_s15 = int_to_ptr.hbm [resolvable:$true] %s69_s15 }
   0xd   :  { %50 = dma.hbm_to_vmem [thread:$0]  %s43_s9, 1024, %s45_s12, [#allocation6], %s604_s26, %s604_s26, %s605_s27  }
   0xe   :  { %s609_s0 = smov [#allocation10]  }
   0xf   :  { %s71_s16 = sshll.u32 %s609_s0, 4  ;;  %s72_s16 = int_to_ptr.vmem [resolvable:$true] %s71_s16 }
  0x10   :  { %74 = dma.hbm_to_vmem [thread:$0]  %s70_s15, 64, %s72_s16, [#allocation9]  }
  0x11   :  { %595 = dma.done.wait [#allocation3], 128  }
  0x12   :  { %596 = vsyncadd [#allocation3], 4294967168 }
  0x13   :  { %597 = dma.done.wait [#allocation6], 1280  }
  0x14   :  { %598 = vsyncadd [#allocation6], 4294966016 }
  0x15   :  { %599 = dma.done.wait [#allocation9], 1088  }
  0x16   :  { %600 = vsyncadd [#allocation9], 4294966208  ;;  %v419_v0 = vld [vmem:[#allocation5 + $0x8] sm:$0xff]  ;;  %v418_v2 = vld [vmem:[#allocation5] sm:$0xff]  ;;  %vm116_vm0 = vcmask 261120   ;;  %v295_v32 = vlaneseq  ;;  %s610_s2 = smov [#allocation11]  }
  0x17   :  { %v427_v1 = vld [vmem:[#allocation7 + $0x38] sm:$0xff]  ;;  %126 = vmatpush.bf16.msra.mxu0 %v419_v0  ;;  %v96_v3 = vld [vmem:[#allocation2] sm:$0xff]  ;;  %v426_v4 = vld [vmem:[#allocation7 + $0x30] sm:$0xff]  ;;  %s331_s4 = sshll.u32 %s610_s2, 4  ;;  %s333_s19 = sshll.u32 %s664_s5, 4  ;;  %s332_s4 = int_to_ptr.vmem [resolvable:$true] %s331_s4  ;;  %s334_s19 = int_to_ptr.hbm [resolvable:$true] %s333_s19 }
  0x18   :  { %201 = vmatpush.bf16.msra.mxu1 %v427_v1  ;;  %v97_v5 = vpack.c.bf16 %v96_v3, %v96_v3  ;;  %v425_v6 = vld [vmem:[#allocation7 + $0x28] sm:$0xff]  ;;  %v424_v7 = vld [vmem:[#allocation7 + $0x20] sm:$0xff]  ;;  %v423_v8 = vld [vmem:[#allocation7 + $0x18] sm:$0xff]  ;;  %v296_v33 = vand.u32 127, %v295_v32 }
  0x19   :  { %v422_v9 = vld [vmem:[#allocation7 + $0x10] sm:$0xff]  ;;  %v421_v10 = vld [vmem:[#allocation7 + $0x8] sm:$0xff]  ;;  %v420_v11 = vld [vmem:[#allocation7] sm:$0xff] }
  0x1a   :  { %v435_v12 = vld [vmem:[#allocation8 + $0x38] sm:$0xff]  ;;  %v434_v13 = vld [vmem:[#allocation8 + $0x30] sm:$0xff]  ;;  %v433_v14 = vld [vmem:[#allocation8 + $0x28] sm:$0xff]  ;;  %vm297_vm1 = vcmp.ge.s32.totalorder %v296_v33, 1  ;;  %vm298_vm2 = vcmp.le.s32.totalorder %v296_v33, 4  ;;  %vm323_vm8 = vcmp.eq.s32.totalorder %v296_v33, 0 }
  0x1b   :  { %127 = vmatpush.bf16.msra.mxu0 %v418_v2  ;;  %282 = vmatpush.bf16.msra.mxu2 %v435_v12  ;;  %v432_v15 = vld [vmem:[#allocation8 + $0x20] sm:$0xff]  ;;  %v431_v16 = vld [vmem:[#allocation8 + $0x18] sm:$0xff]  ;;  %v430_v17 = vld [vmem:[#allocation8 + $0x10] sm:$0xff] }
  0x1c   :  { %202 = vmatpush.bf16.msra.mxu1 %v426_v4  ;;  %v444_v18 = vld [vmem:[#allocation10] ss:$0 sm:$0xff]  ;;  %v429_v24 = vld [vmem:[#allocation8 + $0x8] sm:$0xff]  ;;  %v445_v26 = vld [vmem:[#allocation10 + $0x1] ss:$0 sm:$0xff] }
  0x1d   :  { %v428_v25 = vld [vmem:[#allocation8] sm:$0xff]  ;;  %vm299_vm3 = vmand %vm297_vm1, %vm298_vm2 }
  0x1e   :  { %353 = vmatmul.msk.bf16.vlgmr.msra.gmra.mxu0 %vm116_vm0, %v97_v5  ;;  %v446_v34 = vld [vmem:[#allocation10 + $0x2] ss:$0 sm:$0xff] }
  0x1f   :  { %283 = vmatpush.bf16.msra.mxu2 %v434_v13 }
  0x20   :  { %203 = vmatpush.bf16.msra.mxu1 %v425_v6 }
  0x23   :  { %284 = vmatpush.bf16.msra.mxu2 %v433_v14 }
  0x24   :  { %204 = vmatpush.bf16.msra.mxu1 %v424_v7 }
  0x27   :  { %285 = vmatpush.bf16.msra.mxu2 %v432_v15 }
  0x28   :  { %205 = vmatpush.bf16.msra.mxu1 %v423_v8 }
  0x2b   :  { %286 = vmatpush.bf16.msra.mxu2 %v431_v16 }
  0x2c   :  { %206 = vmatpush.bf16.msra.mxu1 %v422_v9 }
  0x2f   :  { %287 = vmatpush.bf16.msra.mxu2 %v430_v17 }
  0x30   :  { %207 = vmatpush.bf16.msra.mxu1 %v421_v10 }
  0x33   :  { %288 = vmatpush.bf16.msra.mxu2 %v429_v24 }
  0x34   :  { %208 = vmatpush.bf16.msra.mxu1 %v420_v11 }
  0x37   :  { %289 = vmatpush.bf16.msra.mxu2 %v428_v25 }
  0x9b   :  { %v129_v19 = vpop.f32.mrf.mxu0 }
  0x9c   :  { %v130_v20 = vadd.f32 %v444_v18, %v129_v19 }
  0x9e   :  { %v133_v21 = vmax.f32 %v130_v20, 0.0 }
  0xa0   :  { %v134_v22 = vpack.c.bf16 %v133_v21, %v133_v21 }
  0xa2   :  { %209 = vmatmul.bf16.vlgmr.msra.gmra.mxu1 %v134_v22 }
  0xa3   :  { %v131_v23 = vpop.f32.mrf.mxu0 }
 0x11f   :  { %v210_v27 = vpop.f32.mrf.mxu1 }
 0x120   :  { %v211_v28 = vadd.f32 %v445_v26, %v210_v27 }
 0x122   :  { %v214_v29 = vmax.f32 %v211_v28, 0.0 }
 0x124   :  { %v215_v30 = vpack.c.bf16 %v214_v29, %v214_v29 }
 0x126   :  { %290 = vmatmul.bf16.vlgmr.msra.gmra.mxu2 %v215_v30 }
 0x127   :  { %v212_v31 = vpop.f32.mrf.mxu1 }
 0x1a9   :  { %v291_v35 = vpop.f32.mrf.mxu2 }
 0x1aa   :  { %v292_v36 = vadd.f32 %v446_v34, %v291_v35 }
 0x1ac   :  { %v300_v37 = vsel %vm299_vm3, %v292_v36, -inf }
 0x1ad   :  { %301 = vmax.xlane.f32.xlu0 %v300_v37 }
 0x1b1   :  { %v293_v38 = vpop.f32.mrf.mxu2 }
 0x220   :  { %v302_v39 = vpop.xlane.xlu0 %301 }
 0x221   :  { %v303_v40 = vsub.f32 %v300_v37, %v302_v39 }
 0x223   :  { %v304_v41 = vmul.f32 1.442695, %v303_v40 }
 0x225   :  { %447 = vpow2.f32 %v304_v41 }
 0x22b   :  { %v448_v42 = vpop.eup %447 }
 0x22c   :  { %306 = vadd.xlane.f32.xlu0 %v448_v42 }
 0x29f   :  { %v307_v43 = vpop.xlane.xlu0 %306 }
 0x2a0   :  { %449 = vrcp.f32 %v307_v43  ;;  %v319_v47 = vand.u32 2147483648, %v307_v43  ;;  %v317_v49 = vand.u32 2147483647, %v307_v43  ;;  %vm313_vm5 = vweird.f32 %v307_v43 }
 0x2a2   :  { %v320_v51 = vor.u32 1.1754944e-38, %v319_v47  ;;  %vm318_vm7 = vcmp.eq.f32.partialorder %v317_v49, 8.507059e+37 }
 0x2a6   :  { %v450_v44 = vpop.eup %449 }
 0x2a7   :  { %v309_v45 = vmul.f32 %v450_v44, %v307_v43  ;;  %vm314_vm4 = vweird.f32 %v450_v44 }
 0x2a8   :  { %vm315_vm6 = vmor %vm313_vm5, %vm314_vm4 }
 0x2a9   :  { %v310_v46 = vsub.f32 1.0, %v309_v45 }
 0x2ab   :  { %v311_v48 = vmul.f32 %v450_v44, %v310_v46 }
 0x2ad   :  { %v312_v50 = vadd.f32 %v450_v44, %v311_v48 }
 0x2af   :  { %v316_v52 = vsel %vm315_vm6, %v450_v44, %v312_v50 }
 0x2b0   :  { %v321_v53 = vsel %vm318_vm7, %v320_v51, %v316_v52 }
 0x2b1   :  { %v322_v54 = vmul.f32 %v448_v42, %v321_v53 }
 0x2b3   :  { %v324_v55 = vsel %vm323_vm8, %v292_v36, %v322_v54 }
 0x2b4   :  { %325 = vst [vmem:[#allocation11] sm:$0xff] %v324_v55 }
 0x2b5   :  { %336 = dma.vmem_to_hbm [thread:$0]  %s332_s4, 128, %s334_s19, [#allocation4]  }
 0x2b6   :  { %601 = dma.done.wait [#allocation4], 128  }
 0x2b7   :  { %602 = vsyncadd [#allocation4], 4294967168 }
 0x2b8   :  { %341 = vsyncpa [#allocation3], 1 }
 0x2b9   :  { %342 = vsyncpa [#allocation6], 1 }
 0x2ba   :  { %343 = vsyncpa [#allocation9], 1 }
 0x2bb   :  { %344 = vsyncpa [#allocation4], 1 }

</bundles_post_ra>
